<compile_context>
chip_gen: v5e
topology: v5e:2x2
jax: 0.10.0
libtpu: 0.0.40
codegen_flags: <defaults>
</compile_context>

<pallas_src>
import functools
import math

import jax
import jax.numpy as jnp
from jax.experimental import pallas as pl
from jax.experimental.pallas import tpu as pltpu

EPS = 1e-12       # HF ViT layer_norm_eps
NEG_INF = -1e30


def _vmem_limit_bytes():
    cap = 64 * 1024 * 1024
    try:
        info = pltpu.get_tpu_info()
        cap = getattr(info, "vmem_capacity_bytes", cap) or cap
    except Exception:
        pass
    # leave DMA headroom: ~80% of physical, capped at 100 MiB (v5e/v6e 128 MiB)
    return min(int(cap * 4 // 5), 100 * 1024 * 1024)


def _resident(shape):
    """BlockSpec for a small parameter that stays VMEM-resident across the grid."""
    return pl.BlockSpec(shape, lambda *_: (0,) * len(shape))


def _layer_spec(shape_tail):
    """BlockSpec for a [L, ...] stacked parameter streamed along the layer axis."""
    return pl.BlockSpec((1,) + tuple(shape_tail),
                        lambda b, l: (l,) + (0,) * len(shape_tail))


def _ln(v, g, b):
    mu = jnp.mean(v, axis=-1, keepdims=True)
    var = jnp.mean((v - mu) ** 2, axis=-1, keepdims=True)
    return (v - mu) * jax.lax.rsqrt(var + EPS) * g + b


# ---------------------------------------------------------------- kernels ----
def patch_embed_kernel(S, P, patches_ref, w_ref, b_ref, cls_ref, pos_ref, o_ref):
    # patches_ref: [1, Sp, K] bf16 (row 0 and rows >= S are zero: CLS slot / pad)
    # w_ref: [K, D] bf16   b_ref/cls_ref: [1, D] f32   pos_ref: [1, Sp, D] f32
    pp = patches_ref[0]                                             # [Sp, K] bf16
    emb = jnp.dot(pp, w_ref[...], preferred_element_type=jnp.float32)  # [Sp, D]
    Sp, D = emb.shape
    s_idx = jax.lax.broadcasted_iota(jnp.int32, (Sp, D), 0)
    is_patch = (s_idx >= 1) & (s_idx <= P)
    is_cls = s_idx == 0
    valid = s_idx < S
    tok = emb + jnp.where(is_patch, b_ref[...], 0.0)
    tok = tok + jnp.where(is_cls, cls_ref[...], 0.0)
    tok = jnp.where(valid, tok + pos_ref[0], 0.0)
    o_ref[0] = tok.astype(o_ref.dtype)


def fused_blocks_kernel(num_heads, S,
                        x_ref,
                        ln1_g, ln1_b, wqkv, bqkv, wo, bo,
                        ln2_g, ln2_b, w1, b1, w2, b2,
                        lnf_g, lnf_b,
                        o_ref, resid_ref):
    """One (batch, layer) grid step of the full pre-LN encoder stack.

    x_ref   : [1, Sp, D] bf16 patch-embedded tokens (read only at l == 0)
    stacked per-layer params (leading layer axis stripped to 1 by BlockSpec):
      ln*_{g,b}: [1, 1, D], wqkv: [1, D, 3D], bqkv: [1, 1, 3D], wo: [1, D, D],
      bo: [1, 1, D], w1: [1, D, F], b1: [1, 1, F], w2: [1, F, D], b2: [1, 1, D]
    lnf_{g,b}: [1, D] resident final-LN params
    resid_ref: [Sp, D] f32 VMEM scratch carried across the layer axis
    o_ref    : [1, Sp, D] f32, written only at the last layer (after final LN)
    """
    f32, bf = jnp.float32, jnp.bfloat16
    l = pl.program_id(1)

    @pl.when(l == 0)
    def _():
        resid_ref[...] = x_ref[0].astype(f32)

    x = resid_ref[...]                                  # [Sp, D] f32
    Sp, D = x.shape
    Hn = num_heads
    hd = D // Hn
    scale = 1.0 / math.sqrt(hd)

    # --- attention (pre-LN) ---
    h = _ln(x, ln1_g[0], ln1_b[0])                      # [Sp, D]
    qkv = jnp.dot(h.astype(bf), wqkv[0],
                  preferred_element_type=f32) + bqkv[0]  # [Sp, 3D]
    q = qkv[:, :D]                                       # 128-aligned lane slices
    k = qkv[:, D:2 * D]
    v = qkv[:, 2 * D:]
    # head-batched layout [H, Sp, hd] (relayout in f32, cast to bf16 for MXU)
    qh = q.reshape(Sp, Hn, hd).swapaxes(0, 1).astype(bf)
    kh = k.reshape(Sp, Hn, hd).swapaxes(0, 1).astype(bf)
    vh = v.reshape(Sp, Hn, hd).swapaxes(0, 1).astype(bf)

    s = jnp.einsum('hqd,hkd->hqk', qh, kh,
                   preferred_element_type=f32) * scale   # [H, Sp, Sp]
    key_idx = jax.lax.broadcasted_iota(jnp.int32, (1, 1, Sp), 2)
    s = jnp.where(key_idx < S, s, NEG_INF)               # mask padded keys
    s = s - jnp.max(s, axis=-1, keepdims=True)
    p = jnp.exp(s)
    p = p * pl.reciprocal(jnp.sum(p, axis=-1, keepdims=True), approx=True)
    ctx = jnp.einsum('hqk,hkd->hqd', p.astype(bf), vh,
                     preferred_element_type=f32)          # [H, Sp, hd]
    ctx = ctx.swapaxes(0, 1).reshape(Sp, D)               # [Sp, D]
    attn = jnp.dot(ctx.astype(bf), wo[0],
                   preferred_element_type=f32) + bo[0]
    x1 = x + attn

    # --- MLP (pre-LN) ---
    h2 = _ln(x1, ln2_g[0], ln2_b[0])
    m = jnp.dot(h2.astype(bf), w1[0], preferred_element_type=f32) + b1[0]
    # TODO(synk): HF ViT default is exact (erf) GELU; tanh approximation used here.
    m = jax.nn.gelu(m, approximate=True)
    m = jnp.dot(m.astype(bf), w2[0], preferred_element_type=f32) + b2[0]
    resid_ref[...] = x1 + m

    @pl.when(l == pl.num_programs(1) - 1)
    def _():
        # fused final LayerNorm; padded rows are garbage-but-finite and are
        # sliced off outside the kernel.
        o_ref[0] = _ln(resid_ref[...], lnf_g[...], lnf_b[...]).astype(o_ref.dtype)


# ------------------------------------------------------------- parameters ----
def init_vit_params(key, *, in_chans, patch_size, image_size, hidden,
                    num_layers, mlp_dim):
    K = in_chans * patch_size * patch_size
    P = (image_size // patch_size) ** 2
    S = P + 1
    D, F, L = hidden, mlp_dim, num_layers
    keys = jax.random.split(key, 8)

    def w(k, shape, scale=0.02):
        return (scale * jax.random.normal(k, shape)).astype(jnp.bfloat16)

    return {
        'patch_size': patch_size,
        'patch_w': w(keys[0], (K, D)),
        'patch_b': jnp.zeros((1, D), jnp.float32),
        'cls': (0.02 * jax.random.normal(keys[1], (1, D))).astype(jnp.float32),
        'pos': (0.02 * jax.random.normal(keys[2], (1, S, D))).astype(jnp.float32),
        'ln_f_g': jnp.ones((1, D), jnp.float32),
        'ln_f_b': jnp.zeros((1, D), jnp.float32),
        # stacked per-layer parameters (leading axis = layer, streamed in-kernel)
        'ln1_g': jnp.ones((L, 1, D), jnp.float32),
        'ln1_b': jnp.zeros((L, 1, D), jnp.float32),
        'wqkv': w(keys[3], (L, D, 3 * D)),
        'bqkv': jnp.zeros((L, 1, 3 * D), jnp.float32),
        'wo': w(keys[4], (L, D, D)),
        'bo': jnp.zeros((L, 1, D), jnp.float32),
        'ln2_g': jnp.ones((L, 1, D), jnp.float32),
        'ln2_b': jnp.zeros((L, 1, D), jnp.float32),
        'w1': w(keys[5], (L, D, F)),
        'b1': jnp.zeros((L, 1, F), jnp.float32),
        'w2': w(keys[6], (L, F, D)),
        'b2': jnp.zeros((L, 1, D), jnp.float32),
    }


# ----------------------------------------------------------------- forward ---
def vit_last_hidden_state(params, x, *, num_heads):
    B, C, H, W = x.shape
    ps = params['patch_size']
    gh, gw = H // ps, W // ps
    P = gh * gw
    K = C * ps * ps
    D = params['patch_w'].shape[1]
    F = params['w1'].shape[2]
    L = params['wqkv'].shape[0]
    S = P + 1
    Sp = ((S + 127) // 128) * 128          # pad sequence to a multiple of 128
    assert D % num_heads == 0, "hidden must be divisible by num_heads"
    assert D % 128 == 0, "hidden kept lane-dense (multiple of 128)"

    # glue: unfold NCHW into per-batch flattened patches, shifted by one row
    # (CLS slot), cast to bf16 and zero-padded to Sp rows; CLS + pos are fused
    # into the patch-embed kernel (no extra [B,S,D] HBM concat round trip).
    patches = (x.reshape(B, C, gh, ps, gw, ps)
                .transpose(0, 2, 4, 1, 3, 5)
                .reshape(B, P, K)).astype(jnp.bfloat16)
    patches_p = jnp.zeros((B, Sp, K), jnp.bfloat16).at[:, 1:1 + P, :].set(patches)
    pos_p = jnp.zeros((1, Sp, D), jnp.float32).at[:, :S, :].set(params['pos'])

    vmem_limit = _vmem_limit_bytes()
    cp_embed = pltpu.CompilerParams(dimension_semantics=("parallel",),
                                    vmem_limit_bytes=vmem_limit)
    cp_block = pltpu.CompilerParams(dimension_semantics=("parallel", "arbitrary"),
                                    vmem_limit_bytes=vmem_limit)

    tokens = pl.pallas_call(
        functools.partial(patch_embed_kernel, S, P),
        out_shape=jax.ShapeDtypeStruct((B, Sp, D), jnp.bfloat16),
        grid=(B,),
        in_specs=[
            pl.BlockSpec((1, Sp, K), lambda b: (b, 0, 0)),
            _resident((K, D)),        # patch weight (bf16)
            _resident((1, D)),        # patch bias
            _resident((1, D)),        # cls token
            _resident((1, Sp, D)),    # padded positional embedding
        ],
        out_specs=pl.BlockSpec((1, Sp, D), lambda b: (b, 0, 0)),
        compiler_params=cp_embed,
    )(patches_p, params['patch_w'], params['patch_b'], params['cls'], pos_p)

    hidden = pl.pallas_call(
        functools.partial(fused_blocks_kernel, num_heads, S),
        out_shape=jax.ShapeDtypeStruct((B, Sp, D), jnp.float32),
        grid=(B, L),
        in_specs=[
            pl.BlockSpec((1, Sp, D), lambda b, l: (b, 0, 0)),   # tokens (l == 0)
            _layer_spec((1, D)), _layer_spec((1, D)),           # ln1 g / b
            _layer_spec((D, 3 * D)), _layer_spec((1, 3 * D)),   # wqkv, bqkv
            _layer_spec((D, D)), _layer_spec((1, D)),           # wo, bo
            _layer_spec((1, D)), _layer_spec((1, D)),           # ln2 g / b
            _layer_spec((D, F)), _layer_spec((1, F)),           # w1, b1
            _layer_spec((F, D)), _layer_spec((1, D)),           # w2, b2
            _resident((1, D)), _resident((1, D)),               # final LN g / b
        ],
        out_specs=pl.BlockSpec((1, Sp, D), lambda b, l: (b, 0, 0)),
        scratch_shapes=[pltpu.VMEM((Sp, D), jnp.float32)],      # residual stream
        compiler_params=cp_block,
    )(tokens,
      params['ln1_g'], params['ln1_b'], params['wqkv'], params['bqkv'],
      params['wo'], params['bo'], params['ln2_g'], params['ln2_b'],
      params['w1'], params['b1'], params['w2'], params['b2'],
      params['ln_f_g'], params['ln_f_b'])

    return hidden[:, :S, :]                 # last_hidden_state [B, S, D]


def vit_wrapper_forward(params, x, *, aggregation, num_heads=4):
    h = vit_last_hidden_state(params, x, num_heads=num_heads)
    if aggregation in ['netvlad', 'gem']:
        return h[:, 1:, :]      # patch tokens [B, P, D]
    else:
        return h[:, 0, :]       # CLS token    [B, D]


# -------------------------------------------------------------------- main ---
if __name__ == "__main__":
    B, C, H, W = 2, 3, 32, 32
    patch_size, hidden, num_layers, mlp_dim, num_heads = 8, 128, 2, 256, 4

    key = jax.random.PRNGKey(0)
    k_x, k_p = jax.random.split(key)
    x = jax.random.normal(k_x, (B, C, H, W), dtype=jnp.float32)
    params = init_vit_params(k_p, in_chans=C, patch_size=patch_size,
                             image_size=H, hidden=hidden,
                             num_layers=num_layers, mlp_dim=mlp_dim)

    out_gem = vit_wrapper_forward(params, x, aggregation='gem', num_heads=num_heads)
    out_cls = vit_wrapper_forward(params, x, aggregation='cls', num_heads=num_heads)
    jax.block_until_ready((out_gem, out_cls))

    P = (H // patch_size) * (W // patch_size)
    assert out_gem.shape == (B, P, hidden), out_gem.shape
    assert out_cls.shape == (B, hidden), out_cls.shape
    assert bool(jnp.all(jnp.isfinite(out_gem))) and bool(jnp.all(jnp.isfinite(out_cls)))
    print("KERNEL_OK")
</pallas_src>

<mosaic_0001>
module attributes {stable_mosaic.version = 11 : i64} {
  func.func @patch_embed_kernel(%arg0: i32, %arg1: memref<1x128x192xbf16, #tpu.memory_space<vmem>>, %arg2: memref<192x128xbf16, #tpu.memory_space<vmem>>, %arg3: memref<1x128xf32, #tpu.memory_space<vmem>>, %arg4: memref<1x128xf32, #tpu.memory_space<vmem>>, %arg5: memref<1x128x128xf32, #tpu.memory_space<vmem>>, %arg6: memref<1x128x128xbf16, #tpu.memory_space<vmem>>) attributes {dimension_semantics = [#tpu.dimension_semantics<parallel>], iteration_bounds = array<i64: 2>, scalar_prefetch = 0 : i64, scratch_operands = 0 : i64, tpu.core_type = #tpu.core_type<tc>, window_params = [{transform_indices = @transform_0, window_bounds = array<i64: 1, 128, 192>}, {pipeline_mode = #tpu.pipeline_mode<synchronous>, transform_indices = @transform_1, window_bounds = array<i64: 192, 128>}, {pipeline_mode = #tpu.pipeline_mode<synchronous>, transform_indices = @transform_2, window_bounds = array<i64: 1, 128>}, {pipeline_mode = #tpu.pipeline_mode<synchronous>, transform_indices = @transform_3, window_bounds = array<i64: 1, 128>}, {pipeline_mode = #tpu.pipeline_mode<synchronous>, transform_indices = @transform_4, window_bounds = array<i64: 1, 128, 128>}, {transform_indices = @transform_5, window_bounds = array<i64: 1, 128, 128>}]} {
    %c0 = arith.constant 0 : index
    %c0_0 = arith.constant 0 : index
    %c0_1 = arith.constant 0 : index
    %0 = vector.load %arg1[%c0, %c0_0, %c0_1] : memref<1x128x192xbf16, #tpu.memory_space<vmem>>, vector<1x128x192xbf16>
    %1 = vector.shape_cast %0 : vector<1x128x192xbf16> to vector<128x192xbf16>
    %c0_2 = arith.constant 0 : index
    %c0_3 = arith.constant 0 : index
    %2 = vector.load %arg2[%c0_2, %c0_3] : memref<192x128xbf16, #tpu.memory_space<vmem>>, vector<192x128xbf16>
    %cst = arith.constant dense<0.000000e+00> : vector<128x128xf32>
    %3 = tpu.matmul %1, %2, %cst {dimension_numbers = #tpu.dot_dimension_numbers<[1], [0], [0], [1], [0, 0, 1, 1], [], []>} : vector<128x192xbf16>, vector<192x128xbf16>, vector<128x128xf32> -> vector<128x128xf32>
    %4 = tpu.iota {dimensions = array<i32: 0>} : vector<128x128xi32>
    %c1_i32 = arith.constant 1 : i32
    %5 = vector.broadcast %c1_i32 : i32 to vector<128x128xi32>
    %6 = arith.cmpi sge, %4, %5 : vector<128x128xi32>
    %c16_i32 = arith.constant 16 : i32
    %7 = vector.broadcast %c16_i32 : i32 to vector<128x128xi32>
    %8 = arith.cmpi sle, %4, %7 : vector<128x128xi32>
    %9 = arith.andi %6, %8 : vector<128x128xi1>
    %c0_i32 = arith.constant 0 : i32
    %10 = vector.broadcast %c0_i32 : i32 to vector<128x128xi32>
    %11 = arith.cmpi eq, %4, %10 : vector<128x128xi32>
    %c17_i32 = arith.constant 17 : i32
    %12 = vector.broadcast %c17_i32 : i32 to vector<128x128xi32>
    %13 = arith.cmpi slt, %4, %12 : vector<128x128xi32>
    %c0_4 = arith.constant 0 : index
    %c0_5 = arith.constant 0 : index
    %14 = vector.load %arg3[%c0_4, %c0_5] : memref<1x128xf32, #tpu.memory_space<vmem>>, vector<1x128xf32>
    %cst_6 = arith.constant 0.000000e+00 : f32
    %15 = vector.shape_cast %14 : vector<1x128xf32> to vector<1x128xf32>
    %16 = vector.broadcast %15 : vector<1x128xf32> to vector<128x128xf32>
    %17 = vector.broadcast %cst_6 : f32 to vector<128x128xf32>
    %18 = arith.select %9, %16, %17 : vector<128x128xi1>, vector<128x128xf32>
    %19 = arith.addf %3, %18 : vector<128x128xf32>
    %c0_7 = arith.constant 0 : index
    %c0_8 = arith.constant 0 : index
    %20 = vector.load %arg4[%c0_7, %c0_8] : memref<1x128xf32, #tpu.memory_space<vmem>>, vector<1x128xf32>
    %cst_9 = arith.constant 0.000000e+00 : f32
    %21 = vector.shape_cast %20 : vector<1x128xf32> to vector<1x128xf32>
    %22 = vector.broadcast %21 : vector<1x128xf32> to vector<128x128xf32>
    %23 = vector.broadcast %cst_9 : f32 to vector<128x128xf32>
    %24 = arith.select %11, %22, %23 : vector<128x128xi1>, vector<128x128xf32>
    %25 = arith.addf %19, %24 : vector<128x128xf32>
    %c0_10 = arith.constant 0 : index
    %c0_11 = arith.constant 0 : index
    %c0_12 = arith.constant 0 : index
    %26 = vector.load %arg5[%c0_10, %c0_11, %c0_12] : memref<1x128x128xf32, #tpu.memory_space<vmem>>, vector<1x128x128xf32>
    %27 = vector.shape_cast %26 : vector<1x128x128xf32> to vector<128x128xf32>
    %28 = arith.addf %25, %27 : vector<128x128xf32>
    %cst_13 = arith.constant 0.000000e+00 : f32
    %29 = vector.broadcast %cst_13 : f32 to vector<128x128xf32>
    %30 = arith.select %13, %28, %29 : vector<128x128xi1>, vector<128x128xf32>
    %31 = arith.truncf %30 : vector<128x128xf32> to vector<128x128xbf16>
    %c0_14 = arith.constant 0 : index
    %c0_15 = arith.constant 0 : index
    %c0_16 = arith.constant 0 : index
    %32 = vector.load %arg6[%c0_14, %c0_15, %c0_16] : memref<1x128x128xbf16, #tpu.memory_space<vmem>>, vector<1x128x128xbf16>
    %33 = vector.shape_cast %32 : vector<1x128x128xbf16> to vector<128x128xbf16>
    %34 = vector.shape_cast %31 : vector<128x128xbf16> to vector<1x128x128xbf16>
    tpu.vector_store %arg6[%c0_14, %c0_15, %c0_16], %34 {strides = array<i32>} : memref<1x128x128xbf16, #tpu.memory_space<vmem>>, vector<1x128x128xbf16>,
    return
  }
  func.func @transform_0(%arg0: i32) -> (i32, i32, i32) {
    %c0_i32 = arith.constant 0 : i32
    %c0_i32_0 = arith.constant 0 : i32
    %c0_i32_1 = arith.constant 0 : i32
    return %arg0, %c0_i32, %c0_i32_0 : i32, i32, i32
  }
  func.func @transform_1(%arg0: i32) -> (i32, i32) {
    %c0_i32 = arith.constant 0 : i32
    %c0_i32_0 = arith.constant 0 : i32
    %c0_i32_1 = arith.constant 0 : i32
    return %c0_i32, %c0_i32_0 : i32, i32
  }
  func.func @transform_2(%arg0: i32) -> (i32, i32) {
    %c0_i32 = arith.constant 0 : i32
    %c0_i32_0 = arith.constant 0 : i32
    %c0_i32_1 = arith.constant 0 : i32
    return %c0_i32, %c0_i32_0 : i32, i32
  }
  func.func @transform_3(%arg0: i32) -> (i32, i32) {
    %c0_i32 = arith.constant 0 : i32
    %c0_i32_0 = arith.constant 0 : i32
    %c0_i32_1 = arith.constant 0 : i32
    return %c0_i32, %c0_i32_0 : i32, i32
  }
  func.func @transform_4(%arg0: i32) -> (i32, i32, i32) {
    %c0_i32 = arith.constant 0 : i32
    %c0_i32_0 = arith.constant 0 : i32
    %c0_i32_1 = arith.constant 0 : i32
    %c0_i32_2 = arith.constant 0 : i32
    return %c0_i32, %c0_i32_0, %c0_i32_1 : i32, i32, i32
  }
  func.func @transform_5(%arg0: i32) -> (i32, i32, i32) {
    %c0_i32 = arith.constant 0 : i32
    %c0_i32_0 = arith.constant 0 : i32
    %c0_i32_1 = arith.constant 0 : i32
    return %arg0, %c0_i32, %c0_i32_0 : i32, i32, i32
  }
}

</mosaic_0001>

<bundles_post_ra>
// kernel: tpu_custom_call.1
= control target key start
LH: loop header
LB: loop body
LE: loop exit
PB: predicated region body
PF: predicated region fallthrough
CT: control target
= control target key end

     0   :  { %10 = vsyncpa [#allocation3], 0  ;;  %s1397_s0 = inlined_call_operand.vmem [shape: bf16[2,128,192], index: 0, kind: input, shape index: {}]   ;;  %s1398_s1 = inlined_call_operand.vmem [shape: bf16[192,128], index: 1, kind: input, shape index: {}]   ;;  %s1399_s2 = inlined_call_operand.vmem [shape: f32[1,128], index: 2, kind: input, shape index: {}]   ;;  %s1400_s3 = inlined_call_operand.vmem [shape: f32[1,128], index: 3, kind: input, shape index: {}]   ;;  %s1401_s4 = inlined_call_operand.vmem [shape: f32[1,128,128], index: 4, kind: input, shape index: {}]   ;;  %s1402_s5 = inlined_call_operand.hbm [shape: bf16[2,128,128], index: 5, kind: output, shape index: {}]  }
   0x1   :  { %12 = vsyncpa [#allocation3 + $0x1], 0  ;;  %s1204_s18 = smov 0   ;;  %s1206_s19 = smov 0  }
   0x2   :  { %s1208_s20 = smov 0   ;;  %s1210_s21 = smov 0  }
   0x3 LB: > { %s1225_s22 = sadd.s32 4294967295, %s1169_s21   ;;  %s842_s23 = sadd.s32 4294967294, %s1169_s21   ;;  %s1169_s21 = sphi %s1210_s21, %s1408_s21   ;;  %s1165_s20 = sphi %s1208_s20, %s1407_s20   ;;  %s1161_s19 = sphi %s1206_s19, %s1406_s19   ;;  %s1157_s18 = sphi %s1204_s18, %s1405_s18  }
   0x4   : > { %s1229_s24 = sadd.s32 1, %s1169_s21   ;;  %s135_s25 = sadd.s32 1, %s1165_s20 }
   0x5   : > { %s132_s26 = ssub.s32 %s1169_s21, %s1229_s24  ;;  %p145_p0 = scmp.ne.s32.totalorder %s1165_s20, %s1161_s19 }
   0x6   : > { %p133_p1 = scmp.eq.s32.totalorder %s132_s26, 0  ;;  %p146_p2 = scmp.eq.s32.totalorder %s1225_s22, 1 }
   0x7   : > { %p151_p3 = scmp.ne.s32.totalorder %s1161_s19, %s1157_s18  ;;  %p152_p4 = scmp.eq.s32.totalorder %s842_s23, 1 }
   0x8   : > { %s1240_s27 = scalar_select %p133_p1, %s1165_s20, %s135_s25  }
   0x9   : > { %p1242_p5 = por %p146_p2, %p145_p0  ;;  %p1246_p6 = por %p152_p4, %p151_p3 }
   0xa   : > { %p845_p7 = scmp.ge.s32.totalorder %s1169_s21, 1  ;;  %p190_p8 = scmp.lt.s32.totalorder %s1169_s21, 3 }
   0xc   : > { %p191_p9 = pnand %p845_p7, %p190_p8 }
   0xd   : > { %p218_p10 = scmp.lt.s32.totalorder (!%p191_p9), %s1225_s22, 1  ;;  %s215_s23 = sand.u32 (!%p191_p9), 1, %s1161_s19  }
   0xe   : > { %194 = sbr.rel (%p191_p9) target bundleno = 240 (0xf0), region = 40  ;;  %s846_s25 = sshll.u32 (!%p191_p9), %s215_s23, 6 }
   0xf   : > { %s1003_s13 = sshll.u32 (!%p191_p9), %s1225_s22, 6  ;;  %s765_s6 = scalar_lea.sflag (!%p191_p9), [#allocation3], %s215_s23 }
  0x10   : > { %s776_s16 = scalar_lea.hbm (!%p191_p9), %s1402_s5, %s1003_s13 }
  0x11   : > { %s779_s26 = sshll.u32 (!%p191_p9), %s776_s16, 4  ;;  %s780_s26 = int_to_ptr.hbm [resolvable:$true] %s779_s26 }
  0x12   : > { %s1121_s7 = sshra.s32 (!%p191_p9), %s780_s26, 4  ;;  %s1122_s7 = int_to_ptr.hbm [resolvable:$true] %s1121_s7 }
  0x13   : > { %v998_v0 = vld [vmem:[%s1398_s1 + $0x38] sm:$0xff]  ;;  %v997_v2 = vld [vmem:[%s1398_s1 + $0x30] sm:$0xff]  ;;  %s219_s11 = scalar_select %p218_p10, %s1225_s22, 1  ;;  %v996_v4 = vld [vmem:[%s1398_s1 + $0x28] sm:$0xff]  ;;  %vm525_vm0 = vcmask 523264   ;;  %v264_v61 = vlaneseq }
  0x14   : > { %v1002_v1 = vld [vmem:[%s1398_s1 + $0x58] sm:$0xff]  ;;  %550 = vmatpush.bf16.msra.mxu0 %v998_v0  ;;  %1051 = vmatpush.bf16.msra.mxu2 %v998_v0  ;;  %v1001_v3 = vld [vmem:[%s1398_s1 + $0x50] sm:$0xff]  ;;  %v1000_v5 = vld [vmem:[%s1398_s1 + $0x48] sm:$0xff]  ;;  %v1171_v0 = vmov 0.0|0.0   ;;  %s1123_s8 = scalar_lea.hbm %s1122_s7, 64  ;;  %p1128_p0 = scmp.lt.s32.totalorder %s1122_s7, %s1402_s5 }
  0x15   : > { %603 = vmatpush.bf16.msra.mxu1 %v1002_v1  ;;  %1059 = vmatpush.bf16.msra.mxu3 %v1002_v1  ;;  %s974_s14 = sshll.u32 %s219_s11, 7  ;;  %v995_v6 = vld [vmem:[%s1398_s1 + $0x20] sm:$0xff]  ;;  %v994_v13 = vld [vmem:[%s1398_s1 + $0x18] sm:$0xff]  ;;  %v993_v15 = vld [vmem:[%s1398_s1 + $0x10] sm:$0xff]  ;;  %v265_v62 = vshrl.u32 %v264_v61, 7  ;;  %v1011_v1 = vunpack.c.l.bf16 %v1171_v0  ;;  %p1124_p11 = scmp.ne.s32.totalorder %s1122_s7, %s1123_s8 }
  0x16   : > { %s1275_s30 = scalar_lea.vmem %s1397_s0, %s974_s14  ;;  %v999_v7 = vld [vmem:[%s1398_s1 + $0x40] sm:$0xff]  ;;  %v992_v16 = vld [vmem:[%s1398_s1 + $0x8] sm:$0xff]  ;;  %s1127_s11 = scalar_lea.hbm %s1402_s5, 128 }
  0x17   : > { %v975_v8 = vld [vmem:[%s1275_s30 + $0x4] sm:$0xf]  ;;  %v853_v9 = vld [vmem:[%s1275_s30 + $0x8] sm:$0xf0]  ;;  %v985_v10 = vld [vmem:[%s1275_s30 + $0x54] sm:$0xf]  ;;  %p1125_p12 = pnand %p1124_p11, %p1242_p5  ;;  %p1129_p1 = scmp.lt.s32.totalorder %s1127_s11, %s1123_s8 }
  0x18   : > { %551 = vmatpush.bf16.msra.mxu0 %v997_v2  ;;  %1052 = vmatpush.bf16.msra.mxu2 %v997_v2  ;;  %v893_v11 = vld [vmem:[%s1275_s30 + $0x58] sm:$0xf0]  ;;  %v856_v12 = vor.u32 %v975_v8, %v853_v9  ;;  %v991_v17 = vld [vmem:[%s1398_s1] sm:$0xff]  ;;  %v976_v19 = vld [vmem:[%s1275_s30 + $0x4] sm:$0xf0]  ;;  %vm281_vm1 = vcmp.ge.s32.totalorder %v265_v62, 1 }
  0x19   : > { %604 = vmatpush.bf16.msra.mxu1 %v1001_v3  ;;  %1060 = vmatpush.bf16.msra.mxu3 %v1001_v3  ;;  %v896_v14 = vor.u32 %v985_v10, %v893_v11  ;;  %v851_v18 = vld [vmem:[%s1275_s30] sm:$0xf]  ;;  %v984_v21 = vld [vmem:[%s1275_s30 + $0x44] sm:$0xf0]  ;;  %v977_v22 = vld [vmem:[%s1275_s30 + $0x14] sm:$0xf]  ;;  %p1126_p13 = pneg %p1125_p12  ;;  %p1130_p2 = por %p1129_p1, %p1128_p0 }
  0x1a   : > { %v883_v20 = vld [vmem:[%s1275_s30 + $0x40] sm:$0xf]  ;;  %v861_v23 = vld [vmem:[%s1275_s30 + $0x18] sm:$0xf0]  ;;  %v987_v24 = vld [vmem:[%s1275_s30 + $0x64] sm:$0xf]  ;;  %v852_v26 = vor.u32 %v976_v19, %v851_v18 }
  0x1b   : > { %v901_v25 = vld [vmem:[%s1275_s30 + $0x68] sm:$0xf0]  ;;  %v884_v27 = vor.u32 %v984_v21, %v883_v20  ;;  %v864_v28 = vor.u32 %v977_v22, %v861_v23  ;;  %v859_v30 = vld [vmem:[%s1275_s30 + $0x10] sm:$0xf]  ;;  %v978_v31 = vld [vmem:[%s1275_s30 + $0x14] sm:$0xf0]  ;;  %p1131_p3 = pnand %p1130_p2, %p1126_p13 }
  0x1c   : > { %552 = vmatpush.bf16.msra.mxu0 %v996_v4  ;;  %1053 = vmatpush.bf16.msra.mxu2 %v996_v4  ;;  %v904_v29 = vor.u32 %v987_v24, %v901_v25  ;;  %v891_v32 = vld [vmem:[%s1275_s30 + $0x50] sm:$0xf]  ;;  %v986_v33 = vld [vmem:[%s1275_s30 + $0x54] sm:$0xf0]  ;;  %v979_v34 = vld [vmem:[%s1275_s30 + $0x24] sm:$0xf]  ;;  %v860_v38 = vor.u32 %v978_v31, %v859_v30  ;;  %v1017_v4 = vpack.c.bf16 %v1011_v1, %v1011_v1 }
  0x1d   : > { %605 = vmatpush.bf16.msra.mxu1 %v1000_v5  ;;  %1061 = vmatpush.bf16.msra.mxu3 %v1000_v5  ;;  %v869_v35 = vld [vmem:[%s1275_s30 + $0x28] sm:$0xf0]  ;;  %v989_v36 = vld [vmem:[%s1275_s30 + $0x74] sm:$0xf]  ;;  %v909_v37 = vld [vmem:[%s1275_s30 + $0x78] sm:$0xf0]  ;;  %v892_v39 = vor.u32 %v986_v33, %v891_v32 }
  0x1e   : > { %v872_v40 = vor.u32 %v979_v34, %v869_v35  ;;  %v912_v41 = vor.u32 %v989_v36, %v909_v37  ;;  %v867_v42 = vld [vmem:[%s1275_s30 + $0x20] sm:$0xf]  ;;  %v980_v43 = vld [vmem:[%s1275_s30 + $0x24] sm:$0xf0]  ;;  %v981_v46 = vld [vmem:[%s1275_s30 + $0x34] sm:$0xf] }
  0x1f   : > { %v899_v44 = vld [vmem:[%s1275_s30 + $0x60] sm:$0xf]  ;;  %v988_v45 = vld [vmem:[%s1275_s30 + $0x64] sm:$0xf0]  ;;  %v877_v47 = vld [vmem:[%s1275_s30 + $0x38] sm:$0xf0]  ;;  %v868_v48 = vor.u32 %v980_v43, %v867_v42 }
  0x20   : > { %553 = vmatpush.bf16.msra.mxu0 %v995_v6  ;;  %1054 = vmatpush.bf16.msra.mxu2 %v995_v6  ;;  %v900_v49 = vor.u32 %v988_v45, %v899_v44  ;;  %v880_v50 = vor.u32 %v981_v46, %v877_v47  ;;  %v875_v51 = vld [vmem:[%s1275_s30 + $0x30] sm:$0xf]  ;;  %v982_v52 = vld [vmem:[%s1275_s30 + $0x34] sm:$0xf0]  ;;  %v983_v55 = vld [vmem:[%s1275_s30 + $0x44] sm:$0xf] }
  0x21   : > { %606 = vmatpush.bf16.msra.mxu1 %v999_v7  ;;  %1062 = vmatpush.bf16.msra.mxu3 %v999_v7  ;;  %v907_v53 = vld [vmem:[%s1275_s30 + $0x70] sm:$0xf]  ;;  %v990_v54 = vld [vmem:[%s1275_s30 + $0x74] sm:$0xf0]  ;;  %v885_v56 = vld [vmem:[%s1275_s30 + $0x48] sm:$0xf0]  ;;  %v876_v57 = vor.u32 %v982_v52, %v875_v51 }
  0x22   : > { %v908_v58 = vor.u32 %v990_v54, %v907_v53  ;;  %v888_v59 = vor.u32 %v983_v55, %v885_v56  ;;  %v1105_v3 = vld [vmem:[%s1399_s2] ss:$0 sm:$0xff]  ;;  %s1341_s30 = scalar_lea.vmem [#allocation2], %s846_s25  ;;  %vm329_vm2 = vcmp.eq.s32.totalorder %v265_v62, 0  ;;  %v685_v21 = vld [vmem:[%s1401_s4 + $0x8] sm:$0xff]  ;;  %v686_v32 = vld [vmem:[%s1401_s4 + $0x10] sm:$0xff] }
  0x23   : > { %1045 = vst [vmem:[%s1341_s30 + $0x10] sm:$0xff] %v1017_v4   ;;  %v365_v5 = vsel %vm281_vm1, %v1105_v3, 0.0  ;;  %v1106_v10 = vld [vmem:[%s1400_s3] ss:$0 sm:$0xff]  ;;  %s777_s22 = sshll.u32 %s1341_s30, 4  ;;  %s778_s22 = int_to_ptr.vmem [resolvable:$true] %s777_s22 }
  0x24   : > { %961 = vmatmul.msk.bf16.vlgmr.msra.gmra.mxu1 %vm525_vm0, %v856_v12  ;;  %554 = vmatpush.bf16.msra.mxu0 %v994_v13  ;;  %1046 = vst [vmem:[%s1341_s30 + $0x18] sm:$0xff] %v1017_v4   ;;  %v652_v12 = vsel %vm329_vm2, %v1106_v10, 0.0  ;;  %v684_v20 = vld [vmem:[%s1401_s4] sm:$0xff] }
  0x25   : > { %1055 = vmatpush.bf16.msra.mxu2 %v994_v13  ;;  %966 = vmatmul.msk.bf16.vlgmr.msra.gmra.mxu3 %vm525_vm0, %v896_v14  ;;  %1047 = vst [vmem:[%s1341_s30 + $0x20] sm:$0xff] %v1017_v4   ;;  %v267_v14 = vadd.s32 16, %v265_v62 }
  0x26   : > { %1048 = vst [vmem:[%s1341_s30 + $0x28] sm:$0xff] %v1017_v4  }
  0x27   : > { %1049 = vst [vmem:[%s1341_s30 + $0x30] sm:$0xff] %v1017_v4   ;;  %vm299_vm3 = vcmp.le.s32.totalorder %v267_v14, 16  ;;  %vm347_vm4 = vcmp.lt.s32.totalorder %v267_v14, 17 }
  0x28   : > { %555 = vmatpush.bf16.msra.mxu0 %v993_v15  ;;  %1050 = vst [vmem:[%s1341_s30 + $0x38] sm:$0xff] %v1017_v4   ;;  %v367_v25 = vsel %vm299_vm3, %v1105_v3, 0.0 }
  0x29   : > { %1056 = vmatpush.bf16.msra.mxu2 %v993_v15 }
  0x2c   : > { %556 = vmatpush.bf16.msra.mxu0 %v992_v16 }
  0x2d   : > { %1057 = vmatpush.bf16.msra.mxu2 %v992_v16 }
  0x30   : > { %557 = vmatpush.bf16.msra.mxu0 %v991_v17 }
  0x31   : > { %1058 = vmatpush.bf16.msra.mxu2 %v991_v17 }
  0x33   : > { %558 = vmatmul.bf16.vlgmr.msra.gmra.mxu0 %v852_v26 }
  0x34   : > { %578 = vmatmul.bf16.vlgmr.msra.gmra.mxu2 %v884_v27  ;;  %962 = vmatmul.msk.bf16.gmra.mxu1 %vm525_vm0, %v864_v28 }
  0x35   : > { %967 = vmatmul.msk.bf16.gmra.mxu3 %vm525_vm0, %v904_v29 }
  0x43   : > { %563 = vmatmul.bf16.gmra.mxu0 %v860_v38 }
  0x44   : > { %583 = vmatmul.bf16.gmra.mxu2 %v892_v39  ;;  %963 = vmatmul.msk.bf16.gmra.mxu1 %vm525_vm0, %v872_v40 }
  0x45   : > { %968 = vmatmul.msk.bf16.gmra.mxu3 %vm525_vm0, %v912_v41 }
  0x53   : > { %568 = vmatmul.bf16.gmra.mxu0 %v868_v48 }
  0x54   : > { %588 = vmatmul.bf16.gmra.mxu2 %v900_v49  ;;  %964 = vmatmul.msk.bf16.gmra.mxu1 %vm525_vm0, %v880_v50 }
  0x63   : > { %573 = vmatmul.bf16.gmra.mxu0 %v876_v57 }
  0x64   : > { %593 = vmatmul.bf16.gmra.mxu2 %v908_v58  ;;  %965 = vmatmul.msk.bf16.gmra.mxu1 %vm525_vm0, %v888_v59 }
  0xa1   : > { %v608_v60 = vpop.f32.mrf.mxu1 }
  0xa8   : > { %v633_v63 = vpop.f32.mrf.mxu3 }
  0xa9   : > { %v610_v2 = vpop.f32.mrf.mxu1 }
  0xb0   : > { %v559_v6 = vpop.f32.mrf.mxu0  ;;  %v635_v7 = vpop.f32.mrf.mxu3 }
  0xb1   : > { %v560_v8 = vadd.f32 %v559_v6, %v365_v5  ;;  %v613_v9 = vpop.f32.mrf.mxu1 }
  0xb3   : > { %v609_v11 = vadd.f32 %v608_v60, %v560_v8 }
  0xb5   : > { %v668_v17 = vadd.f32 %v652_v12, %v609_v11 }
  0xb7   : > { %v579_v13 = vpop.f32.mrf.mxu2  ;;  %v700_v23 = vadd.f32 %v684_v20, %v668_v17 }
  0xb8   : > { %v561_v15 = vpop.f32.mrf.mxu0  ;;  %v638_v16 = vpop.f32.mrf.mxu3 }
  0xb9   : > { %v562_v18 = vadd.f32 %v1105_v3, %v561_v15  ;;  %v615_v19 = vpop.f32.mrf.mxu1 }
  0xbb   : > { %v611_v22 = vadd.f32 %v610_v2, %v562_v18 }
  0xbd   : > { %v701_v24 = vadd.f32 %v685_v21, %v611_v22 }
  0xbf   : > { %v1007_v26 = vpack.c.bf16 %v701_v24, %v700_v23  ;;  %v581_v27 = vpop.f32.mrf.mxu2 }
  0xc0   : > { %v564_v28 = vpop.f32.mrf.mxu0  ;;  %v640_v29 = vpop.f32.mrf.mxu3 }
  0xc1   : > { %1008 = vst [vmem:[%s1341_s30] sm:$0xff] %v1007_v26   ;;  %v565_v30 = vadd.f32 %v564_v28, %v367_v25  ;;  %v618_v31 = vpop.f32.mrf.mxu1 }
  0xc3   : > { %v614_v33 = vadd.f32 %v613_v9, %v565_v30 }
  0xc5   : > { %v702_v34 = vadd.f32 %v686_v32, %v614_v33 }
  0xc7   : > { %v718_v35 = vsel %vm347_vm4, %v702_v34, 0.0  ;;  %v584_v36 = vpop.f32.mrf.mxu2 }
  0xc8   : > { %v1012_v37 = vpack.c.bf16 %v1011_v1, %v718_v35  ;;  %v566_v38 = vpop.f32.mrf.mxu0  ;;  %v643_v39 = vpop.f32.mrf.mxu3 }
  0xc9   : > { %v620_v40 = vpop.f32.mrf.mxu1 }
  0xca   : > { %1044 = vst [vmem:[%s1341_s30 + $0x8] sm:$0xff] %v1012_v37  }
  0xcb   : > { %1134 = shalt.err (!%p1131_p3)
}
  0xcc   : > { %s1172_s23 = smov 64   ;;  %s1173_s30 = smov 4  }
  0xcd   : > { %1063 = dma.vmem_to_hbm [thread:$0]  (%p1242_p5), %s778_s22, 1024, %s780_s26, %s765_s6, %s1172_s23, %s1172_s23, %s1173_s30  }
  0xcf   : > { %v586_v41 = vpop.f32.mrf.mxu2 }
  0xd0   : > { %v569_v42 = vpop.f32.mrf.mxu0  ;;  %v645_v43 = vpop.f32.mrf.mxu3 }
  0xd1   : > { %v623_v44 = vpop.f32.mrf.mxu1 }
  0xd7   : > { %v589_v45 = vpop.f32.mrf.mxu2 }
  0xd8   : > { %v571_v46 = vpop.f32.mrf.mxu0 }
  0xd9   : > { %v625_v47 = vpop.f32.mrf.mxu1 }
  0xdf   : > { %v591_v48 = vpop.f32.mrf.mxu2 }
  0xe0   : > { %v574_v49 = vpop.f32.mrf.mxu0 }
  0xe1   : > { %v628_v50 = vpop.f32.mrf.mxu1 }
  0xe7   : > { %v594_v51 = vpop.f32.mrf.mxu2 }
  0xe8   : > { %v576_v52 = vpop.f32.mrf.mxu0 }
  0xe9   : > { %v630_v53 = vpop.f32.mrf.mxu1 }
  0xef   : > { %v596_v54 = vpop.f32.mrf.mxu2 }
  0xf0 PF: > { %p1069_p4 = scmp.ge.s32.totalorder %s1169_s21, 2  ;;  %s794_s28 = sand.u32 1, %s1157_s18  }
  0xf1   : > { %s795_s14 = scalar_lea.sflag [#allocation3], %s794_s28 }
  0xf2   : > { %p1066_p5 = pnand %p1069_p4, %p1246_p6 }
  0xf4   : > { %p1067_p7 = pneg %p1066_p5 }
  0xf6   : > { %1152 = dma.done.wait (%p1067_p7), %s795_s14, 1024  }
  0xf7   : > { %1154 = vsyncadd (%p1067_p7), %s795_s14, 4294966272  ;;  %p15_p8 = scmp.ge.s32.totalorder %s1229_s24, 4   ;;  %s1405_s18 = smov %s1161_s19 }
  0xf8   : > { %s1406_s19 = smov %s1165_s20  ;;  %s1407_s20 = smov %s1240_s27 }
  0xf9   : > { %s1408_s21 = smov %s1229_s24  ;;  %17 = sbr.rel (!%p15_p8) target bundleno = 3 (0x3), region = 75 }
  0xfe   :  { %801 = vsyncpa [#allocation3], 1 }
  0xff   :  { %803 = vsyncpa [#allocation3 + $0x1], 1 }

</bundles_post_ra>
